<compile_context>
chip_gen: v6e
topology: v6e:2x2x1
jax: 0.10.0
libtpu: 0.0.40
codegen_flags: <defaults>
</compile_context>

<pallas_src>
import functools

import numpy as np
import jax
import jax.numpy as jnp
from jax.experimental import pallas as pl
from jax.experimental.pallas import tpu as pltpu


PACK = 2                 # 8x8 blocks packed per row -> 128 f32 lanes (1 vreg)
LANES = PACK * 64        # 128


def _round_up(x, m):
    return ((x + m - 1) // m) * m


def _basis_64x64():
    """(64, 64) cosine basis with alpha and the 0.25 scale folded in."""
    alpha = np.array([1.0 / np.sqrt(2)] + [1.0] * 7)
    alpha2d = np.outer(alpha, alpha).astype(np.float32)                  # (8, 8)
    k = np.arange(8, dtype=np.float64)
    # cos((2u+1) * x * pi / 16) as (x, u)
    cos_xu = np.cos((2.0 * k[None, :] + 1.0) * k[:, None] * np.pi / 16.0)
    # basis[x, y, u, v] = cos_xu[x, u] * cos_xu[y, v]
    basis = (cos_xu[:, None, :, None] * cos_xu[None, :, None, :]).astype(np.float32)
    # out[b, uv] = sum_xy img[b, xy] * (0.25 * alpha[xy] * basis[xy, uv]) + 128
    return (0.25 * alpha2d.reshape(64, 1) * basis.reshape(64, 64)).astype(np.float32)


@functools.lru_cache(maxsize=None)
def _packed_basis():
    """(LANES, LANES) block-diagonal basis so PACK blocks share one lane row."""
    packed = np.kron(np.eye(PACK, dtype=np.float32), _basis_64x64())     # (128, 128)
    return jnp.asarray(packed, dtype=jnp.float32)


def _idct_kernel(img_ref, basis_ref, out_ref):
    # img_ref:   (TILE_R, 128)  PACK flattened 8x8 coefficient blocks per row
    # basis_ref: (128, 128)     block-diagonal scaled cosine basis
    # out_ref:   (TILE_R, 128)  reconstructed pixel blocks (same packing)
    out_ref[...] = jnp.dot(img_ref[...], basis_ref[...],
                           preferred_element_type=jnp.float32) + 128.0


def idct_8x8(image, *, max_tile_rows=2048):
    """image: (batch, 8, 8) float32 -> (batch, 8, 8) float32."""
    assert image.ndim == 3 and image.shape[1:] == (8, 8)
    B = image.shape[0]
    basis = _packed_basis()

    img_flat = image.reshape(B, 64).astype(jnp.float32)

    # Pack PACK blocks per lane-dense row.  Pick the tile size so that the
    # batch pads to at most 7 extra rows (never a full extra tile) while each
    # tile stays a multiple of 8 sublanes and <= max_tile_rows.
    rows = -(-B // PACK)                       # ceil(B / PACK)
    rows8 = _round_up(rows, 8)
    grid = pl.cdiv(rows8, max_tile_rows)
    tile_r = _round_up(-(-rows8 // grid), 8)
    rows_pad = tile_r * grid
    b_pad = rows_pad * PACK
    if b_pad != B:
        img_flat = jnp.pad(img_flat, ((0, b_pad - B), (0, 0)))
    img_packed = img_flat.reshape(rows_pad, LANES)

    cost = pl.CostEstimate(
        flops=2 * rows_pad * LANES * LANES,
        transcendentals=0,
        bytes_accessed=2 * rows_pad * LANES * 4 + LANES * LANES * 4,
    )

    out_packed = pl.pallas_call(
        _idct_kernel,
        out_shape=jax.ShapeDtypeStruct((rows_pad, LANES), jnp.float32),
        grid=(grid,),
        in_specs=[
            pl.BlockSpec((tile_r, LANES), lambda i: (i, 0)),
            pl.BlockSpec((LANES, LANES), lambda i: (0, 0)),
        ],
        out_specs=pl.BlockSpec((tile_r, LANES), lambda i: (i, 0)),
        compiler_params=pltpu.CompilerParams(
            dimension_semantics=("parallel",),   # megacore sharding on v7x
        ),
        cost_estimate=cost,
    )(img_packed, basis)

    out_flat = out_packed.reshape(b_pad, 64)[:B]
    return out_flat.reshape(B, 8, 8)


def _reference(image):
    # Pure-JAX reference matching the PyTorch module exactly.
    alpha = np.array([1.0 / np.sqrt(2)] + [1.0] * 7)
    alpha2d = jnp.asarray(np.outer(alpha, alpha).astype(np.float32))
    k = np.arange(8, dtype=np.float64)
    cos_xu = np.cos((2.0 * k[None, :] + 1.0) * k[:, None] * np.pi / 16.0)
    basis = jnp.asarray(
        (cos_xu[:, None, :, None] * cos_xu[None, :, None, :]).astype(np.float32))
    scaled = image * alpha2d
    return 0.25 * jnp.einsum('bxy,xyuv->buv', scaled, basis) + 128.0


if __name__ == "__main__":
    # batch of 16 8x8 DCT coefficient blocks
    x = jax.random.normal(jax.random.PRNGKey(0), (16, 8, 8), jnp.float32) * 50.0
    out = idct_8x8(x)
    jax.block_until_ready(out)
    np.testing.assert_allclose(np.asarray(out), np.asarray(_reference(x)),
                               rtol=1e-5, atol=1e-3)

    # odd batch size exercises the PACK / row-padding path
    x2 = jax.random.normal(jax.random.PRNGKey(1), (17, 8, 8), jnp.float32) * 50.0
    out2 = idct_8x8(x2)
    jax.block_until_ready(out2)
    np.testing.assert_allclose(np.asarray(out2), np.asarray(_reference(x2)),
                               rtol=1e-5, atol=1e-3)

    # larger batch exercises the multi-tile grid path
    x3 = jax.random.normal(jax.random.PRNGKey(2), (4099, 8, 8), jnp.float32) * 50.0
    out3 = idct_8x8(x3, max_tile_rows=1024)
    jax.block_until_ready(out3)
    np.testing.assert_allclose(np.asarray(out3), np.asarray(_reference(x3)),
                               rtol=1e-5, atol=1e-3)

    print("KERNEL_OK")
</pallas_src>

<mosaic_0001>
module attributes {stable_mosaic.version = 11 : i64} {
  func.func @_idct_kernel(%arg0: i32, %arg1: memref<8x128xf32, #tpu.memory_space<vmem>>, %arg2: memref<128x128xf32, #tpu.memory_space<vmem>>, %arg3: memref<8x128xf32, #tpu.memory_space<vmem>>) attributes {dimension_semantics = [#tpu.dimension_semantics<parallel>], iteration_bounds = array<i64: 1>, scalar_prefetch = 0 : i64, scratch_operands = 0 : i64, tpu.core_type = #tpu.core_type<tc>, window_params = [{transform_indices = @transform_0, window_bounds = array<i64: 8, 128>}, {pipeline_mode = #tpu.pipeline_mode<synchronous>, transform_indices = @transform_1, window_bounds = array<i64: 128, 128>}, {transform_indices = @transform_2, window_bounds = array<i64: 8, 128>}]} {
    %c0 = arith.constant 0 : index
    %c0_0 = arith.constant 0 : index
    %0 = vector.load %arg1[%c0, %c0_0] : memref<8x128xf32, #tpu.memory_space<vmem>>, vector<8x128xf32>
    %c0_1 = arith.constant 0 : index
    %c0_2 = arith.constant 0 : index
    %1 = vector.load %arg2[%c0_1, %c0_2] : memref<128x128xf32, #tpu.memory_space<vmem>>, vector<128x128xf32>
    %cst = arith.constant dense<0.000000e+00> : vector<8x128xf32>
    %2 = tpu.matmul %0, %1, %cst {dimension_numbers = #tpu.dot_dimension_numbers<[1], [0], [0], [1], [0, 0, 1, 1], [], []>} : vector<8x128xf32>, vector<128x128xf32>, vector<8x128xf32> -> vector<8x128xf32>
    %cst_3 = arith.constant 1.280000e+02 : f32
    %3 = vector.broadcast %cst_3 : f32 to vector<8x128xf32>
    %4 = arith.addf %2, %3 : vector<8x128xf32>
    %c0_4 = arith.constant 0 : index
    %c0_5 = arith.constant 0 : index
    %5 = vector.load %arg3[%c0_4, %c0_5] : memref<8x128xf32, #tpu.memory_space<vmem>>, vector<8x128xf32>
    tpu.vector_store %arg3[%c0_4, %c0_5], %4 {strides = array<i32>} : memref<8x128xf32, #tpu.memory_space<vmem>>, vector<8x128xf32>,
    return
  }
  func.func @transform_0(%arg0: i32) -> (i32, i32) {
    %c0_i32 = arith.constant 0 : i32
    %c0_i32_0 = arith.constant 0 : i32
    return %arg0, %c0_i32 : i32, i32
  }
  func.func @transform_1(%arg0: i32) -> (i32, i32) {
    %c0_i32 = arith.constant 0 : i32
    %c0_i32_0 = arith.constant 0 : i32
    %c0_i32_1 = arith.constant 0 : i32
    return %c0_i32, %c0_i32_0 : i32, i32
  }
  func.func @transform_2(%arg0: i32) -> (i32, i32) {
    %c0_i32 = arith.constant 0 : i32
    %c0_i32_0 = arith.constant 0 : i32
    return %arg0, %c0_i32 : i32, i32
  }
}

</mosaic_0001>

<bundles_post_ra>
// kernel: tpu_custom_call.1
= control target key start
LH: loop header
LB: loop body
LE: loop exit
PB: predicated region body
PF: predicated region fallthrough
CT: control target
= control target key end

     0   :  { %7 = vsyncpa [#allocation3], 0  ;;  %s298_s0 = inlined_call_operand.hbm [shape: f32[8,128], index: 0, kind: input, shape index: {}]   ;;  %s299_s1 = inlined_call_operand.hbm [shape: f32[128,128], index: 1, kind: input, shape index: {}]   ;;  %s300_s2 = inlined_call_operand.hbm [shape: f32[8,128], index: 2, kind: output, shape index: {}]  }
   0x1   :  { %8 = vsyncpa [#allocation6], 0 }
   0x2   :  { %9 = vsyncpa [#allocation4], 0  ;;  %s267_s9 = smov [#allocation2]   ;;  %s268_s11 = smov [#allocation5]  }
   0x3   :  { %s16_s10 = sshll.u32 %s267_s9, 4  ;;  %s25_s12 = sshll.u32 %s268_s11, 4  ;;  %s17_s10 = int_to_ptr.vmem [resolvable:$true] %s16_s10  ;;  %s26_s12 = int_to_ptr.vmem [resolvable:$true] %s25_s12 }
   0x4   :  { %s209_s13 = scalar_lea.vmem %s17_s10, 128  ;;  %p214_p1 = scmp.lt.s32.totalorder %s17_s10, %s17_s10 }
   0x5   :  { %p210_p0 = scmp.ne.s32.totalorder %s17_s10, %s209_s13  ;;  %p215_p2 = scmp.lt.s32.totalorder %s209_s13, %s209_s13 }
   0x7   :  { %p216_p3 = por %p215_p2, %p214_p1 }
   0x9   :  { %p217_p4 = pnand %p216_p3, %p210_p0 }
   0xb   :  { %220 = shalt.err (!%p217_p4)
}
   0xc   :  { %19 = dma.hbm_to_vmem [thread:$0]  %s298_s0, 128, %s17_s10, [#allocation3]  }
   0xd   :  { %s229_s16 = scalar_lea.vmem %s26_s12, 2048  ;;  %p234_p6 = scmp.lt.s32.totalorder %s26_s12, %s26_s12 }
   0xe   :  { %p230_p5 = scmp.ne.s32.totalorder %s26_s12, %s229_s16  ;;  %p235_p7 = scmp.lt.s32.totalorder %s229_s16, %s229_s16 }
  0x10   :  { %p236_p8 = por %p235_p7, %p234_p6 }
  0x12   :  { %p237_p9 = pnand %p236_p8, %p230_p5 }
  0x14   :  { %240 = shalt.err (!%p237_p9)
}
  0x15   :  { %s269_s17 = smov 128   ;;  %s270_s18 = smov 8  }
  0x16   :  { %31 = dma.hbm_to_vmem [thread:$0]  %s299_s1, 2048, %s26_s12, [#allocation6], %s269_s17, %s269_s17, %s270_s18  }
  0x17   :  { %261 = dma.done.wait [#allocation3], 128  }
  0x18   :  { %262 = vsyncadd [#allocation3], 4294967168 }
  0x19   :  { %263 = dma.done.wait [#allocation6], 2048  }
  0x1a   :  { %264 = vsyncadd [#allocation6], 4294965248  ;;  %v271_v0 = vmov 0.0   ;;  %vm272_vm0 = vmmov 0   ;;  %v54_v1 = vld [vmem:[#allocation5 + $0x78] sm:$0xff]  ;;  %v53_v2 = vld [vmem:[#allocation5 + $0x70] sm:$0xff] }
  0x1b   :  { %159 = vmatprep.subr.mxu0 %v271_v0  ;;  %191 = vmatprep.mubr.msk.f32.mxu0 %vm272_vm0, %v271_v0  ;;  %v52_v3 = vld [vmem:[#allocation5 + $0x68] sm:$0xff]  ;;  %v51_v4 = vld [vmem:[#allocation5 + $0x60] sm:$0xff]  ;;  %v50_v5 = vld [vmem:[#allocation5 + $0x58] sm:$0xff]  ;;  %s273_s0 = smov [#allocation7]  }
  0x1c   :  { %160 = vmatpush3.msra.mxu0 %v54_v1  ;;  %v49_v6 = vld [vmem:[#allocation5 + $0x50] sm:$0xff]  ;;  %v48_v7 = vld [vmem:[#allocation5 + $0x48] sm:$0xff]  ;;  %v47_v8 = vld [vmem:[#allocation5 + $0x40] sm:$0xff]  ;;  %s132_s1 = sshll.u32 %s273_s0, 4  ;;  %s133_s1 = int_to_ptr.vmem [resolvable:$true] %s132_s1 }
  0x1d   :  { %161 = vmatprep.subr.mxu0 %v271_v0  ;;  %v46_v9 = vld [vmem:[#allocation5 + $0x38] sm:$0xff]  ;;  %v45_v10 = vld [vmem:[#allocation5 + $0x30] sm:$0xff]  ;;  %v44_v11 = vld [vmem:[#allocation5 + $0x28] sm:$0xff]  ;;  %s241_s21 = scalar_lea.vmem %s133_s1, 128  ;;  %p246_p11 = scmp.lt.s32.totalorder %s133_s1, %s133_s1 }
  0x1e   :  { %162 = vmatpush3.msra.mxu0 %v53_v2  ;;  %v43_v12 = vld [vmem:[#allocation5 + $0x20] sm:$0xff]  ;;  %v42_v13 = vld [vmem:[#allocation5 + $0x18] sm:$0xff]  ;;  %v41_v14 = vld [vmem:[#allocation5 + $0x10] sm:$0xff]  ;;  %p242_p10 = scmp.ne.s32.totalorder %s133_s1, %s241_s21  ;;  %p247_p12 = scmp.lt.s32.totalorder %s241_s21, %s241_s21 }
  0x1f   :  { %163 = vmatprep.subr.mxu0 %v271_v0  ;;  %v40_v15 = vld [vmem:[#allocation5 + $0x8] sm:$0xff]  ;;  %v39_v16 = vld [vmem:[#allocation5] sm:$0xff]  ;;  %v38_v17 = vld [vmem:[#allocation2] sm:$0xff] }
  0x20   :  { %164 = vmatpush3.msra.mxu0 %v52_v3  ;;  %p248_p13 = por %p247_p12, %p246_p11 }
  0x21   :  { %165 = vmatprep.subr.mxu0 %v271_v0 }
  0x22   :  { %166 = vmatpush3.msra.mxu0 %v51_v4  ;;  %p249_p0 = pnand %p248_p13, %p242_p10 }
  0x23   :  { %167 = vmatprep.subr.mxu0 %v271_v0 }
  0x24   :  { %168 = vmatpush3.msra.mxu0 %v50_v5 }
  0x25   :  { %169 = vmatprep.subr.mxu0 %v271_v0 }
  0x26   :  { %170 = vmatpush3.msra.mxu0 %v49_v6 }
  0x27   :  { %171 = vmatprep.subr.mxu0 %v271_v0 }
  0x28   :  { %172 = vmatpush3.msra.mxu0 %v48_v7 }
  0x29   :  { %173 = vmatprep.subr.mxu0 %v271_v0 }
  0x2a   :  { %174 = vmatpush3.msra.mxu0 %v47_v8 }
  0x2b   :  { %175 = vmatprep.subr.mxu0 %v271_v0 }
  0x2c   :  { %176 = vmatpush3.msra.mxu0 %v46_v9 }
  0x2d   :  { %177 = vmatprep.subr.mxu0 %v271_v0 }
  0x2e   :  { %178 = vmatpush3.msra.mxu0 %v45_v10 }
  0x2f   :  { %179 = vmatprep.subr.mxu0 %v271_v0 }
  0x30   :  { %180 = vmatpush3.msra.mxu0 %v44_v11 }
  0x31   :  { %181 = vmatprep.subr.mxu0 %v271_v0 }
  0x32   :  { %182 = vmatpush3.msra.mxu0 %v43_v12 }
  0x33   :  { %183 = vmatprep.subr.mxu0 %v271_v0 }
  0x34   :  { %184 = vmatpush3.msra.mxu0 %v42_v13 }
  0x35   :  { %185 = vmatprep.subr.mxu0 %v271_v0 }
  0x36   :  { %186 = vmatpush3.msra.mxu0 %v41_v14 }
  0x37   :  { %187 = vmatprep.subr.mxu0 %v271_v0 }
  0x38   :  { %188 = vmatpush3.msra.mxu0 %v40_v15 }
  0x39   :  { %189 = vmatprep.subr.mxu0 %v271_v0 }
  0x3a   :  { %190 = vmatpush3.msra.mxu0 %v39_v16 }
  0x3b   :  { %192 = vmatmul.mubr.f32.vlgmr.msra.gmra.mxu0 %v38_v17 }
  0xfb   :  { %v121_v18 = vpop.f32.mrf.mxu0 }
  0xfc   :  { %v122_v19 = vadd.f32 128.0, %v121_v18 }
  0xfd   :  { %v193_v20 = vpop.f32.mrf.mxu0 }
  0xfe   :  { %125 = vst [vmem:[#allocation7] sm:$0xff] %v122_v19 }
  0xff   :  { %252 = shalt.err (!%p249_p0)
}
 0x100   :  { %135 = dma.vmem_to_hbm [thread:$0]  %s133_s1, 128, %s300_s2, [#allocation4]  }
 0x101   :  { %265 = dma.done.wait [#allocation4], 128  }
 0x102   :  { %266 = vsyncadd [#allocation4], 4294967168 }
 0x103   :  { %139 = vsyncpa [#allocation3], 1 }
 0x104   :  { %140 = vsyncpa [#allocation6], 1 }
 0x105   :  { %141 = vsyncpa [#allocation4], 1 }

</bundles_post_ra>
